<compile_context>
chip_gen: v7x
topology: tpu7x:2x2x1
jax: 0.10.0
libtpu: 0.0.40
codegen_flags: <defaults>
</compile_context>

<pallas_src>
import functools

import jax
import jax.numpy as jnp
from jax.experimental import pallas as pl
from jax.experimental.pallas import tpu as pltpu


# ----------------------------------------------------------------------------
# Fused Pallas kernel: one grid step == one CM2TransformerLayer over the whole batch
# ----------------------------------------------------------------------------
def _cm2_encoder_kernel(
    x_ref,        # (B*S, D)  input embeddings (read only at layer 0)
    bias_ref,     # (B, 1, S) additive key-padding bias (0 valid / -1e30 padded)
    wqkv_ref,     # (1, D, 3D)
    bqkv_ref,     # (1, 1, 3D)
    wo_ref,       # (1, D, D)
    w1_ref,       # (1, D, F)
    b1_ref,       # (1, 1, F)
    w2_ref,       # (1, F, D)
    small_ref,    # (1, 8, D)  rows: [bo, b2, g1, beta1, g2, beta2, wg, pad]
    out_ref,      # (B*S, D)  resident activation / final output
    attn_scr,     # VMEM (B, S, D) f32 scratch for per-head attention outputs
    *, B, S, nhead, eps, compute_dtype):

    D = out_ref.shape[-1]
    hd = D // nhead
    scale = 1.0 / float(hd) ** 0.5

    # Layer 0: seed the resident activation with the input embeddings.
    @pl.when(pl.program_id(0) == 0)
    def _():
        out_ref[...] = x_ref[...]

    h = out_ref[...].astype(jnp.float32)              # (B*S, D), resident across layers

    small = small_ref[0].astype(jnp.float32)          # (8, D)
    bo, b2 = small[0:1], small[1:2]
    g1, beta1 = small[2:3], small[3:4]
    g2, beta2 = small[4:5], small[5:6]
    wg = small[6:7]

    bias = bias_ref[...].astype(jnp.float32)          # (B, 1, S)

    # ---- fused QKV projection: one MXU matmul for the whole batch ----------------
    qkv = jnp.dot(h.astype(compute_dtype), wqkv_ref[0],
                  preferred_element_type=jnp.float32) + bqkv_ref[0]   # (B*S, 3D) f32
    qkv3 = qkv.reshape(B, S, 3 * D)
    q3 = qkv3[..., :D] * scale
    k3 = qkv3[..., D:2 * D]
    v3 = qkv3[..., 2 * D:]

    # ---- multi-head self attention (batch handled by batched einsum) -------------
    for hidx in range(nhead):                         # nhead is small & static
        sl = slice(hidx * hd, (hidx + 1) * hd)
        qh = q3[..., sl].astype(compute_dtype)        # (B, S, hd)
        kh = k3[..., sl].astype(compute_dtype)
        vh = v3[..., sl].astype(compute_dtype)
        s = jnp.einsum('bqd,bkd->bqk', qh, kh,
                       preferred_element_type=jnp.float32)            # (B, S, S)
        s = s + bias                                   # additive key-padding mask (f32)
        # NOTE: rows with every key masked get uniform attention over padding here,
        # whereas PyTorch MultiheadAttention would produce NaN for that edge case.
        m = jnp.max(s, axis=-1, keepdims=True)
        p = jnp.exp(s - m)
        denom = jnp.sum(p, axis=-1, keepdims=True)
        p = p * pl.reciprocal(denom, approx=True)
        oh = jnp.einsum('bqk,bkd->bqd', p.astype(compute_dtype), vh,
                        preferred_element_type=jnp.float32)           # (B, S, hd)
        attn_scr[:, :, sl] = oh

    attn = jnp.dot(attn_scr[...].reshape(B * S, D).astype(compute_dtype), wo_ref[0],
                   preferred_element_type=jnp.float32) + bo           # (B*S, D)

    # ---- residual + LayerNorm1 (norm_first=False) ---------------------------------
    y = h + attn
    mu = jnp.mean(y, axis=-1, keepdims=True)
    var = jnp.mean((y - mu) ** 2, axis=-1, keepdims=True)
    y = (y - mu) * jax.lax.rsqrt(var + eps) * g1 + beta1

    # ---- gated feed-forward block --------------------------------------------------
    g = jax.nn.sigmoid(jnp.sum(y * wg, axis=-1, keepdims=True))       # (B*S, 1)
    h1 = jnp.dot(y.astype(compute_dtype), w1_ref[0],
                 preferred_element_type=jnp.float32) + b1_ref[0]      # (B*S, F)
    h1 = jnp.maximum(h1 * g, 0.0)                                     # relu activation
    ff = jnp.dot(h1.astype(compute_dtype), w2_ref[0],
                 preferred_element_type=jnp.float32) + b2             # (B*S, D)

    # ---- residual + LayerNorm2 -----------------------------------------------------
    z = y + ff
    mu2 = jnp.mean(z, axis=-1, keepdims=True)
    var2 = jnp.mean((z - mu2) ** 2, axis=-1, keepdims=True)
    z = (z - mu2) * jax.lax.rsqrt(var2 + eps) * g2 + beta2

    out_ref[...] = z.astype(out_ref.dtype)


# ----------------------------------------------------------------------------
# Wrapper: packs per-layer weights into (L, ...) stacks and calls one pallas_call
# ----------------------------------------------------------------------------
def cm2_encoder_pallas(x, attention_mask, layer_params, *, nhead, eps=1e-5,
                       compute_dtype=jnp.float32):
    """CM2Encoder.forward: x (B,S,D), attention_mask (B,S) with 1 = valid token."""
    B, S, D = x.shape
    assert D % nhead == 0
    L = len(layer_params)
    F = layer_params[0]["w1_t"].shape[-1]
    BS = B * S

    def stk(key, dtype=None):
        arr = jnp.stack([p[key] for p in layer_params], axis=0)
        return arr.astype(dtype) if dtype is not None else arr.astype(jnp.float32)

    # Large matrices: cast to compute dtype (halves weight DMA when bf16).
    wqkv = jnp.concatenate([stk("wq_t"), stk("wk_t"), stk("wv_t")],
                           axis=-1).astype(compute_dtype)              # (L, D, 3D)
    wo = stk("wo_t", compute_dtype)                                    # (L, D, D)
    w1 = stk("w1_t", compute_dtype)                                    # (L, D, F)
    w2 = stk("w2_t", compute_dtype)                                    # (L, F, D)
    # Small vectors stay f32 (added after f32 accumulation), packed together.
    bqkv = jnp.concatenate([stk("bq"), stk("bk"), stk("bv")], axis=-1)  # (L, 1, 3D)
    b1 = stk("b1")                                                      # (L, 1, F)
    small = jnp.concatenate(
        [stk("bo"), stk("b2"), stk("g1"), stk("beta1"),
         stk("g2"), stk("beta2"), stk("wg"), jnp.zeros((L, 1, D), jnp.float32)],
        axis=1)                                                         # (L, 8, D)

    x2 = x.reshape(BS, D)
    bias = jnp.where(attention_mask > 0, 0.0, -1e30).astype(
        jnp.float32).reshape(B, 1, S)

    kernel = functools.partial(_cm2_encoder_kernel, B=B, S=S, nhead=nhead,
                               eps=eps, compute_dtype=compute_dtype)

    out2 = pl.pallas_call(
        kernel,
        out_shape=jax.ShapeDtypeStruct((BS, D), x.dtype),
        grid_spec=pltpu.PrefetchScalarGridSpec(
            num_scalar_prefetch=0,
            grid=(L,),
            in_specs=[
                pl.BlockSpec((BS, D), lambda l: (0, 0)),          # x (loaded once)
                pl.BlockSpec((B, 1, S), lambda l: (0, 0, 0)),     # mask bias (once)
                pl.BlockSpec((1, D, 3 * D), lambda l: (l, 0, 0)), # per-layer weights
                pl.BlockSpec((1, 1, 3 * D), lambda l: (l, 0, 0)),
                pl.BlockSpec((1, D, D), lambda l: (l, 0, 0)),
                pl.BlockSpec((1, D, F), lambda l: (l, 0, 0)),
                pl.BlockSpec((1, 1, F), lambda l: (l, 0, 0)),
                pl.BlockSpec((1, F, D), lambda l: (l, 0, 0)),
                pl.BlockSpec((1, 8, D), lambda l: (l, 0, 0)),
            ],
            # Constant block index across the layer axis -> the activation stays
            # resident in VMEM for all layers and is written back to HBM once.
            out_specs=pl.BlockSpec((BS, D), lambda l: (0, 0)),
            scratch_shapes=[pltpu.VMEM((B, S, D), jnp.float32)],
        ),
        compiler_params=pltpu.CompilerParams(
            dimension_semantics=("arbitrary",),      # layers are a sequential chain
            vmem_limit_bytes=48 * 1024 * 1024,       # explicit budget (fits v7x 64MiB)
        ),
    )(x2, bias, wqkv, bqkv, wo, w1, b1, w2, small)
    return out2.reshape(B, S, D)


# ----------------------------------------------------------------------------
# Deterministic synthetic parameter init (shapes from CM2TransformerLayer.__init__)
# ----------------------------------------------------------------------------
def init_layer_params(key, d_model, ffn_dim):
    ks = jax.random.split(key, 8)
    scl = 0.05
    wq = jax.random.normal(ks[0], (d_model, d_model), jnp.float32) * scl
    wk = jax.random.normal(ks[1], (d_model, d_model), jnp.float32) * scl
    wv = jax.random.normal(ks[2], (d_model, d_model), jnp.float32) * scl
    wo = jax.random.normal(ks[3], (d_model, d_model), jnp.float32) * scl
    w1 = jax.random.normal(ks[4], (ffn_dim, d_model), jnp.float32) * scl
    w2 = jax.random.normal(ks[5], (d_model, ffn_dim), jnp.float32) * scl
    wg = jax.random.normal(ks[6], (1, d_model), jnp.float32) * scl
    b = jax.random.normal(ks[7], (4, max(d_model, ffn_dim)), jnp.float32) * scl
    return dict(
        wq_t=wq.T, wk_t=wk.T, wv_t=wv.T,
        bq=b[0:1, :d_model], bk=b[1:2, :d_model], bv=b[2:3, :d_model],
        wo_t=wo.T, bo=b[3:4, :d_model] * 0.0 + 0.01,
        wg=wg,
        w1_t=w1.T, b1=b[0:1, :ffn_dim] * 0.5,
        w2_t=w2.T, b2=b[1:2, :d_model] * 0.5,
        g1=jnp.ones((1, d_model), jnp.float32), beta1=jnp.zeros((1, d_model), jnp.float32),
        g2=jnp.ones((1, d_model), jnp.float32), beta2=jnp.zeros((1, d_model), jnp.float32),
    )


# ----------------------------------------------------------------------------
# Pure-JAX reference (same math, f32) for correctness checking
# ----------------------------------------------------------------------------
def _layer_ref(x, mask, p, nhead, eps=1e-5):
    B, S, D = x.shape
    hd = D // nhead
    q = x @ p["wq_t"] + p["bq"]
    k = x @ p["wk_t"] + p["bk"]
    v = x @ p["wv_t"] + p["bv"]
    q = q.reshape(B, S, nhead, hd).transpose(0, 2, 1, 3) / jnp.sqrt(hd)
    k = k.reshape(B, S, nhead, hd).transpose(0, 2, 1, 3)
    v = v.reshape(B, S, nhead, hd).transpose(0, 2, 1, 3)
    s = jnp.einsum("bhqd,bhkd->bhqk", q, k)
    s = jnp.where(mask[:, None, None, :] > 0, s, -1e30)
    pnm = jax.nn.softmax(s, axis=-1)
    attn = jnp.einsum("bhqk,bhkd->bhqd", pnm, v).transpose(0, 2, 1, 3).reshape(B, S, D)
    attn = attn @ p["wo_t"] + p["bo"]

    def ln(t, g, b):
        mu = t.mean(-1, keepdims=True)
        var = ((t - mu) ** 2).mean(-1, keepdims=True)
        return (t - mu) * jax.lax.rsqrt(var + eps) * g + b

    y = ln(x + attn, p["g1"], p["beta1"])
    g = jax.nn.sigmoid(jnp.sum(y * p["wg"], -1, keepdims=True))
    h = jnp.maximum((y @ p["w1_t"] + p["b1"]) * g, 0.0)
    ff = h @ p["w2_t"] + p["b2"]
    return ln(y + ff, p["g2"], p["beta2"])


def _encoder_ref(x, mask, layer_params, nhead):
    out = x
    for p in layer_params:
        out = _layer_ref(out, mask, p, nhead)
    return out


# ----------------------------------------------------------------------------
if __name__ == "__main__":
    # Small shapes consistent with the module: hidden_dim=32, ffn=64, 2 heads, 2 layers.
    B, S, D = 2, 8, 32
    NHEAD, FFN, NUM_LAYER = 2, 64, 2

    key = jax.random.PRNGKey(0)
    k_x, k_l0, k_ls = jax.random.split(key, 3)

    x = jax.random.normal(k_x, (B, S, D), jnp.float32)
    # attention_mask: 1 = valid token, 0 = padding (last 2 tokens of batch 1 are padded)
    attention_mask = jnp.array(
        [[1.0] * S, [1.0] * (S - 2) + [0.0] * 2], dtype=jnp.float32)

    # Layer 0 has its own params; the stacked nn.TransformerEncoder deep-copies one
    # layer, so the remaining (NUM_LAYER - 1) layers start from identical parameters.
    params_first = init_layer_params(k_l0, D, FFN)
    params_shared = init_layer_params(k_ls, D, FFN)
    layer_params = [params_first] + [params_shared] * (NUM_LAYER - 1)

    ref = _encoder_ref(x, attention_mask, layer_params, NHEAD)

    # f32 compute path (tolerance accounts for the approximate EUP reciprocal).
    out = cm2_encoder_pallas(x, attention_mask, layer_params, nhead=NHEAD,
                             compute_dtype=jnp.float32)
    out = jax.block_until_ready(out)
    assert out.shape == (B, S, D)
    assert jnp.allclose(out, ref, rtol=2e-2, atol=2e-2), (
        float(jnp.max(jnp.abs(out - ref))))

    # bf16 matmul-operand path (f32 accumulation) — looser tolerance.
    out_bf16 = cm2_encoder_pallas(x, attention_mask, layer_params, nhead=NHEAD,
                                  compute_dtype=jnp.bfloat16)
    out_bf16 = jax.block_until_ready(out_bf16)
    assert out_bf16.shape == (B, S, D)
    assert jnp.all(jnp.isfinite(out_bf16))
    assert jnp.allclose(out_bf16.astype(jnp.float32), ref, rtol=5e-2, atol=1.5e-1), (
        float(jnp.max(jnp.abs(out_bf16.astype(jnp.float32) - ref))))

    print("KERNEL_OK")
</pallas_src>

<mosaic_0001>
module attributes {stable_mosaic.version = 11 : i64} {
  func.func @_cm2_encoder_kernel(%arg0: i32, %arg1: memref<16x32xf32, #tpu.memory_space<vmem>>, %arg2: memref<2x1x8xf32, #tpu.memory_space<vmem>>, %arg3: memref<1x32x96xf32, #tpu.memory_space<vmem>>, %arg4: memref<1x1x96xf32, #tpu.memory_space<vmem>>, %arg5: memref<1x32x32xf32, #tpu.memory_space<vmem>>, %arg6: memref<1x32x64xf32, #tpu.memory_space<vmem>>, %arg7: memref<1x1x64xf32, #tpu.memory_space<vmem>>, %arg8: memref<1x64x32xf32, #tpu.memory_space<vmem>>, %arg9: memref<1x8x32xf32, #tpu.memory_space<vmem>>, %arg10: memref<16x32xf32, #tpu.memory_space<vmem>>, %arg11: memref<2x8x32xf32, #tpu.memory_space<vmem>>) attributes {dimension_semantics = [#tpu.dimension_semantics<arbitrary>], iteration_bounds = array<i64: 2>, scalar_prefetch = 0 : i64, scratch_operands = 1 : i64, tpu.core_type = #tpu.core_type<tc>, window_params = [{pipeline_mode = #tpu.pipeline_mode<synchronous>, transform_indices = @transform_0, window_bounds = array<i64: 16, 32>}, {pipeline_mode = #tpu.pipeline_mode<synchronous>, transform_indices = @transform_1, window_bounds = array<i64: 2, 1, 8>}, {transform_indices = @transform_2, window_bounds = array<i64: 1, 32, 96>}, {transform_indices = @transform_3, window_bounds = array<i64: 1, 1, 96>}, {transform_indices = @transform_4, window_bounds = array<i64: 1, 32, 32>}, {transform_indices = @transform_5, window_bounds = array<i64: 1, 32, 64>}, {transform_indices = @transform_6, window_bounds = array<i64: 1, 1, 64>}, {transform_indices = @transform_7, window_bounds = array<i64: 1, 64, 32>}, {transform_indices = @transform_8, window_bounds = array<i64: 1, 8, 32>}, {pipeline_mode = #tpu.pipeline_mode<synchronous>, transform_indices = @transform_9, window_bounds = array<i64: 16, 32>}]} {
    %c0_i32 = arith.constant 0 : i32
    %0 = arith.cmpi eq, %arg0, %c0_i32 : i32
    %1 = arith.extui %0 : i1 to i32
    %c0_i32_0 = arith.constant 0 : i32
    %2 = arith.cmpi ne, %1, %c0_i32_0 : i32
    scf.if %2 {
      %c0_61 = arith.constant 0 : index
      %c0_62 = arith.constant 0 : index
      %142 = vector.load %arg1[%c0_61, %c0_62] : memref<16x32xf32, #tpu.memory_space<vmem>>, vector<16x32xf32>
      %c0_63 = arith.constant 0 : index
      %c0_64 = arith.constant 0 : index
      %143 = vector.load %arg10[%c0_63, %c0_64] : memref<16x32xf32, #tpu.memory_space<vmem>>, vector<16x32xf32>
      tpu.vector_store %arg10[%c0_63, %c0_64], %142 {strides = array<i32>} : memref<16x32xf32, #tpu.memory_space<vmem>>, vector<16x32xf32>,
    } else {
    }
    %c0 = arith.constant 0 : index
    %c0_1 = arith.constant 0 : index
    %3 = vector.load %arg10[%c0, %c0_1] : memref<16x32xf32, #tpu.memory_space<vmem>>, vector<16x32xf32>
    %c0_2 = arith.constant 0 : index
    %c0_3 = arith.constant 0 : index
    %c0_4 = arith.constant 0 : index
    %4 = vector.load %arg9[%c0_2, %c0_3, %c0_4] : memref<1x8x32xf32, #tpu.memory_space<vmem>>, vector<1x8x32xf32>
    %5 = vector.shape_cast %4 : vector<1x8x32xf32> to vector<8x32xf32>
    %6 = vector.extract_strided_slice %5 {offsets = [0, 0], sizes = [1, 32], strides = [1, 1]} : vector<8x32xf32> to vector<1x32xf32>
    %7 = vector.extract_strided_slice %5 {offsets = [1, 0], sizes = [1, 32], strides = [1, 1]} : vector<8x32xf32> to vector<1x32xf32>
    %8 = vector.extract_strided_slice %5 {offsets = [2, 0], sizes = [1, 32], strides = [1, 1]} : vector<8x32xf32> to vector<1x32xf32>
    %9 = vector.extract_strided_slice %5 {offsets = [3, 0], sizes = [1, 32], strides = [1, 1]} : vector<8x32xf32> to vector<1x32xf32>
    %10 = vector.extract_strided_slice %5 {offsets = [4, 0], sizes = [1, 32], strides = [1, 1]} : vector<8x32xf32> to vector<1x32xf32>
    %11 = vector.extract_strided_slice %5 {offsets = [5, 0], sizes = [1, 32], strides = [1, 1]} : vector<8x32xf32> to vector<1x32xf32>
    %12 = vector.extract_strided_slice %5 {offsets = [6, 0], sizes = [1, 32], strides = [1, 1]} : vector<8x32xf32> to vector<1x32xf32>
    %c0_5 = arith.constant 0 : index
    %c0_6 = arith.constant 0 : index
    %c0_7 = arith.constant 0 : index
    %13 = vector.load %arg2[%c0_5, %c0_6, %c0_7] : memref<2x1x8xf32, #tpu.memory_space<vmem>>, vector<2x1x8xf32>
    %c0_8 = arith.constant 0 : index
    %c0_9 = arith.constant 0 : index
    %c0_10 = arith.constant 0 : index
    %14 = vector.load %arg3[%c0_8, %c0_9, %c0_10] : memref<1x32x96xf32, #tpu.memory_space<vmem>>, vector<1x32x96xf32>
    %15 = vector.shape_cast %14 : vector<1x32x96xf32> to vector<32x96xf32>
    %cst = arith.constant dense<0.000000e+00> : vector<16x96xf32>
    %16 = tpu.matmul %3, %15, %cst {dimension_numbers = #tpu.dot_dimension_numbers<[1], [0], [0], [1], [0, 0, 1, 1], [], []>} : vector<16x32xf32>, vector<32x96xf32>, vector<16x96xf32> -> vector<16x96xf32>
    %c0_11 = arith.constant 0 : index
    %c0_12 = arith.constant 0 : index
    %c0_13 = arith.constant 0 : index
    %17 = vector.load %arg4[%c0_11, %c0_12, %c0_13] : memref<1x1x96xf32, #tpu.memory_space<vmem>>, vector<1x1x96xf32>
    %18 = vector.shape_cast %17 : vector<1x1x96xf32> to vector<1x96xf32>
    %19 = vector.broadcast %18 : vector<1x96xf32> to vector<16x96xf32>
    %20 = arith.addf %16, %19 : vector<16x96xf32>
    %21 = vector.shape_cast %20 : vector<16x96xf32> to vector<2x8x96xf32>
    %22 = vector.extract_strided_slice %21 {offsets = [0, 0, 0], sizes = [2, 8, 32], strides = [1, 1, 1]} : vector<2x8x96xf32> to vector<2x8x32xf32>
    %cst_14 = arith.constant 2.500000e-01 : f32
    %23 = vector.broadcast %cst_14 : f32 to vector<2x8x32xf32>
    %24 = arith.mulf %22, %23 : vector<2x8x32xf32>
    %25 = vector.extract_strided_slice %21 {offsets = [0, 0, 32], sizes = [2, 8, 32], strides = [1, 1, 1]} : vector<2x8x96xf32> to vector<2x8x32xf32>
    %26 = vector.extract_strided_slice %21 {offsets = [0, 0, 64], sizes = [2, 8, 32], strides = [1, 1, 1]} : vector<2x8x96xf32> to vector<2x8x32xf32>
    %27 = vector.extract_strided_slice %24 {offsets = [0, 0, 0], sizes = [2, 8, 16], strides = [1, 1, 1]} : vector<2x8x32xf32> to vector<2x8x16xf32>
    %28 = vector.extract_strided_slice %25 {offsets = [0, 0, 0], sizes = [2, 8, 16], strides = [1, 1, 1]} : vector<2x8x32xf32> to vector<2x8x16xf32>
    %29 = vector.extract_strided_slice %26 {offsets = [0, 0, 0], sizes = [2, 8, 16], strides = [1, 1, 1]} : vector<2x8x32xf32> to vector<2x8x16xf32>
    "tpu.trace_start"() <{level = 10 : i32, message = "bqd,bkd->bqk"}> : () -> ()
    %cst_15 = arith.constant dense<0.000000e+00> : vector<2x8x8xf32>
    %30 = tpu.matmul %27, %28, %cst_15 {dimension_numbers = #tpu.dot_dimension_numbers<[2], [2], [1], [1], [0, 0, 0, 1, 1, 1], [0], [0]>} : vector<2x8x16xf32>, vector<2x8x16xf32>, vector<2x8x8xf32> -> vector<2x8x8xf32>
    "tpu.trace_stop"() : () -> ()
    %31 = vector.broadcast %13 : vector<2x1x8xf32> to vector<2x8x8xf32>
    %32 = arith.addf %30, %31 : vector<2x8x8xf32>
    %cst_16 = arith.constant dense<0xFF800000> : vector<2x8xf32>
    %33 = vector.multi_reduction <maximumf>, %32, %cst_16 [2] : vector<2x8x8xf32> to vector<2x8xf32>
    %34 = vector.shape_cast %33 : vector<2x8xf32> to vector<2x8x1xf32>
    %35 = vector.broadcast %34 : vector<2x8x1xf32> to vector<2x8x8xf32>
    %36 = arith.subf %32, %35 : vector<2x8x8xf32>
    %37 = math.exp %36 : vector<2x8x8xf32>
    %cst_17 = arith.constant dense<0.000000e+00> : vector<2x8xf32>
    %38 = vector.multi_reduction <add>, %37, %cst_17 [2] : vector<2x8x8xf32> to vector<2x8xf32>
    %39 = vector.shape_cast %38 : vector<2x8xf32> to vector<2x8x1xf32>
    %40 = tpu.reciprocal %39 {approx = true} : vector<2x8x1xf32> -> vector<2x8x1xf32>
    %41 = vector.broadcast %40 : vector<2x8x1xf32> to vector<2x8x8xf32>
    %42 = arith.mulf %37, %41 : vector<2x8x8xf32>
    "tpu.trace_start"() <{level = 10 : i32, message = "bqk,bkd->bqd"}> : () -> ()
    %cst_18 = arith.constant dense<0.000000e+00> : vector<2x8x16xf32>
    %43 = tpu.matmul %42, %29, %cst_18 {dimension_numbers = #tpu.dot_dimension_numbers<[2], [1], [1], [2], [0, 0, 0, 1, 1, 2], [0], [0]>} : vector<2x8x8xf32>, vector<2x8x16xf32>, vector<2x8x16xf32> -> vector<2x8x16xf32>
    "tpu.trace_stop"() : () -> ()
    %c0_19 = arith.constant 0 : index
    %c0_20 = arith.constant 0 : index
    %c0_21 = arith.constant 0 : index
    %44 = vector.load %arg11[%c0_19, %c0_20, %c0_21] : memref<2x8x32xf32, #tpu.memory_space<vmem>>, vector<2x8x16xf32>
    tpu.vector_store %arg11[%c0_19, %c0_20, %c0_21], %43 {strides = array<i32>} : memref<2x8x32xf32, #tpu.memory_space<vmem>>, vector<2x8x16xf32>,
    %45 = vector.extract_strided_slice %24 {offsets = [0, 0, 16], sizes = [2, 8, 16], strides = [1, 1, 1]} : vector<2x8x32xf32> to vector<2x8x16xf32>
    %46 = vector.extract_strided_slice %25 {offsets = [0, 0, 16], sizes = [2, 8, 16], strides = [1, 1, 1]} : vector<2x8x32xf32> to vector<2x8x16xf32>
    %47 = vector.extract_strided_slice %26 {offsets = [0, 0, 16], sizes = [2, 8, 16], strides = [1, 1, 1]} : vector<2x8x32xf32> to vector<2x8x16xf32>
    "tpu.trace_start"() <{level = 10 : i32, message = "bqd,bkd->bqk"}> : () -> ()
    %cst_22 = arith.constant dense<0.000000e+00> : vector<2x8x8xf32>
    %48 = tpu.matmul %45, %46, %cst_22 {dimension_numbers = #tpu.dot_dimension_numbers<[2], [2], [1], [1], [0, 0, 0, 1, 1, 1], [0], [0]>} : vector<2x8x16xf32>, vector<2x8x16xf32>, vector<2x8x8xf32> -> vector<2x8x8xf32>
    "tpu.trace_stop"() : () -> ()
    %49 = vector.broadcast %13 : vector<2x1x8xf32> to vector<2x8x8xf32>
    %50 = arith.addf %48, %49 : vector<2x8x8xf32>
    %cst_23 = arith.constant dense<0xFF800000> : vector<2x8xf32>
    %51 = vector.multi_reduction <maximumf>, %50, %cst_23 [2] : vector<2x8x8xf32> to vector<2x8xf32>
    %52 = vector.shape_cast %51 : vector<2x8xf32> to vector<2x8x1xf32>
    %53 = vector.broadcast %52 : vector<2x8x1xf32> to vector<2x8x8xf32>
    %54 = arith.subf %50, %53 : vector<2x8x8xf32>
    %55 = math.exp %54 : vector<2x8x8xf32>
    %cst_24 = arith.constant dense<0.000000e+00> : vector<2x8xf32>
    %56 = vector.multi_reduction <add>, %55, %cst_24 [2] : vector<2x8x8xf32> to vector<2x8xf32>
    %57 = vector.shape_cast %56 : vector<2x8xf32> to vector<2x8x1xf32>
    %58 = tpu.reciprocal %57 {approx = true} : vector<2x8x1xf32> -> vector<2x8x1xf32>
    %59 = vector.broadcast %58 : vector<2x8x1xf32> to vector<2x8x8xf32>
    %60 = arith.mulf %55, %59 : vector<2x8x8xf32>
    "tpu.trace_start"() <{level = 10 : i32, message = "bqk,bkd->bqd"}> : () -> ()
    %cst_25 = arith.constant dense<0.000000e+00> : vector<2x8x16xf32>
    %61 = tpu.matmul %60, %47, %cst_25 {dimension_numbers = #tpu.dot_dimension_numbers<[2], [1], [1], [2], [0, 0, 0, 1, 1, 2], [0], [0]>} : vector<2x8x8xf32>, vector<2x8x16xf32>, vector<2x8x16xf32> -> vector<2x8x16xf32>
    "tpu.trace_stop"() : () -> ()
    %c0_26 = arith.constant 0 : index
    %c0_27 = arith.constant 0 : index
    %c16 = arith.constant 16 : index
    %62 = vector.load %arg11[%c0_26, %c0_27, %c16] : memref<2x8x32xf32, #tpu.memory_space<vmem>>, vector<2x8x16xf32>
    tpu.vector_store %arg11[%c0_26, %c0_27, %c16], %61 {strides = array<i32>} : memref<2x8x32xf32, #tpu.memory_space<vmem>>, vector<2x8x16xf32>,
    %c0_28 = arith.constant 0 : index
    %c0_29 = arith.constant 0 : index
    %c0_30 = arith.constant 0 : index
    %63 = vector.load %arg11[%c0_28, %c0_29, %c0_30] : memref<2x8x32xf32, #tpu.memory_space<vmem>>, vector<2x8x32xf32>
    %64 = vector.shape_cast %63 : vector<2x8x32xf32> to vector<16x32xf32>
    %c0_31 = arith.constant 0 : index
    %c0_32 = arith.constant 0 : index
    %c0_33 = arith.constant 0 : index
    %65 = vector.load %arg5[%c0_31, %c0_32, %c0_33] : memref<1x32x32xf32, #tpu.memory_space<vmem>>, vector<1x32x32xf32>
    %66 = vector.shape_cast %65 : vector<1x32x32xf32> to vector<32x32xf32>
    %cst_34 = arith.constant dense<0.000000e+00> : vector<16x32xf32>
    %67 = tpu.matmul %64, %66, %cst_34 {dimension_numbers = #tpu.dot_dimension_numbers<[1], [0], [0], [1], [0, 0, 1, 1], [], []>} : vector<16x32xf32>, vector<32x32xf32>, vector<16x32xf32> -> vector<16x32xf32>
    %68 = vector.broadcast %6 : vector<1x32xf32> to vector<16x32xf32>
    %69 = arith.addf %67, %68 : vector<16x32xf32>
    %70 = arith.addf %3, %69 : vector<16x32xf32>
    %cst_35 = arith.constant dense<0.000000e+00> : vector<16xf32>
    %71 = vector.multi_reduction <add>, %70, %cst_35 [1] : vector<16x32xf32> to vector<16xf32>
    %72 = vector.shape_cast %71 : vector<16xf32> to vector<16x1xf32>
    %cst_36 = arith.constant 3.200000e+01 : f32
    %73 = vector.broadcast %cst_36 : f32 to vector<16x1xf32>
    %74 = arith.divf %72, %73 : vector<16x1xf32>
    %75 = vector.broadcast %74 : vector<16x1xf32> to vector<16x32xf32>
    %76 = arith.subf %70, %75 : vector<16x32xf32>
    %77 = arith.mulf %76, %76 : vector<16x32xf32>
    %cst_37 = arith.constant dense<0.000000e+00> : vector<16xf32>
    %78 = vector.multi_reduction <add>, %77, %cst_37 [1] : vector<16x32xf32> to vector<16xf32>
    %79 = vector.shape_cast %78 : vector<16xf32> to vector<16x1xf32>
    %cst_38 = arith.constant 3.200000e+01 : f32
    %80 = vector.broadcast %cst_38 : f32 to vector<16x1xf32>
    %81 = arith.divf %79, %80 : vector<16x1xf32>
    %82 = vector.broadcast %74 : vector<16x1xf32> to vector<16x32xf32>
    %83 = arith.subf %70, %82 : vector<16x32xf32>
    %cst_39 = arith.constant 9.99999974E-6 : f32
    %84 = vector.broadcast %cst_39 : f32 to vector<16x1xf32>
    %85 = arith.addf %81, %84 : vector<16x1xf32>
    %86 = math.rsqrt %85 : vector<16x1xf32>
    %87 = vector.broadcast %86 : vector<16x1xf32> to vector<16x32xf32>
    %88 = arith.mulf %83, %87 : vector<16x32xf32>
    %89 = vector.broadcast %8 : vector<1x32xf32> to vector<16x32xf32>
    %90 = arith.mulf %88, %89 : vector<16x32xf32>
    %91 = vector.broadcast %9 : vector<1x32xf32> to vector<16x32xf32>
    %92 = arith.addf %90, %91 : vector<16x32xf32>
    %93 = vector.broadcast %12 : vector<1x32xf32> to vector<16x32xf32>
    %94 = arith.mulf %92, %93 : vector<16x32xf32>
    %cst_40 = arith.constant dense<0.000000e+00> : vector<16xf32>
    %95 = vector.multi_reduction <add>, %94, %cst_40 [1] : vector<16x32xf32> to vector<16xf32>
    %96 = vector.shape_cast %95 : vector<16xf32> to vector<16x1xf32>
    %97 = arith.negf %96 : vector<16x1xf32>
    %98 = math.exp %97 : vector<16x1xf32>
    %cst_41 = arith.constant 1.000000e+00 : f32
    %99 = vector.broadcast %cst_41 : f32 to vector<16x1xf32>
    %100 = arith.addf %99, %98 : vector<16x1xf32>
    %101 = arith.divf %99, %100 : vector<16x1xf32>
    %c0_42 = arith.constant 0 : index
    %c0_43 = arith.constant 0 : index
    %c0_44 = arith.constant 0 : index
    %102 = vector.load %arg6[%c0_42, %c0_43, %c0_44] : memref<1x32x64xf32, #tpu.memory_space<vmem>>, vector<1x32x64xf32>
    %103 = vector.shape_cast %102 : vector<1x32x64xf32> to vector<32x64xf32>
    %cst_45 = arith.constant dense<0.000000e+00> : vector<16x64xf32>
    %104 = tpu.matmul %92, %103, %cst_45 {dimension_numbers = #tpu.dot_dimension_numbers<[1], [0], [0], [1], [0, 0, 1, 1], [], []>} : vector<16x32xf32>, vector<32x64xf32>, vector<16x64xf32> -> vector<16x64xf32>
    %c0_46 = arith.constant 0 : index
    %c0_47 = arith.constant 0 : index
    %c0_48 = arith.constant 0 : index
    %105 = vector.load %arg7[%c0_46, %c0_47, %c0_48] : memref<1x1x64xf32, #tpu.memory_space<vmem>>, vector<1x1x64xf32>
    %106 = vector.shape_cast %105 : vector<1x1x64xf32> to vector<1x64xf32>
    %107 = vector.broadcast %106 : vector<1x64xf32> to vector<16x64xf32>
    %108 = arith.addf %104, %107 : vector<16x64xf32>
    %109 = vector.broadcast %101 : vector<16x1xf32> to vector<16x64xf32>
    %110 = arith.mulf %108, %109 : vector<16x64xf32>
    %cst_49 = arith.constant 0.000000e+00 : f32
    %111 = vector.broadcast %cst_49 : f32 to vector<16x64xf32>
    %112 = arith.maximumf %110, %111 : vector<16x64xf32>
    %c0_50 = arith.constant 0 : index
    %c0_51 = arith.constant 0 : index
    %c0_52 = arith.constant 0 : index
    %113 = vector.load %arg8[%c0_50, %c0_51, %c0_52] : memref<1x64x32xf32, #tpu.memory_space<vmem>>, vector<1x64x32xf32>
    %114 = vector.shape_cast %113 : vector<1x64x32xf32> to vector<64x32xf32>
    %cst_53 = arith.constant dense<0.000000e+00> : vector<16x32xf32>
    %115 = tpu.matmul %112, %114, %cst_53 {dimension_numbers = #tpu.dot_dimension_numbers<[1], [0], [0], [1], [0, 0, 1, 1], [], []>} : vector<16x64xf32>, vector<64x32xf32>, vector<16x32xf32> -> vector<16x32xf32>
    %116 = vector.broadcast %7 : vector<1x32xf32> to vector<16x32xf32>
    %117 = arith.addf %115, %116 : vector<16x32xf32>
    %118 = arith.addf %92, %117 : vector<16x32xf32>
    %cst_54 = arith.constant dense<0.000000e+00> : vector<16xf32>
    %119 = vector.multi_reduction <add>, %118, %cst_54 [1] : vector<16x32xf32> to vector<16xf32>
    %120 = vector.shape_cast %119 : vector<16xf32> to vector<16x1xf32>
    %cst_55 = arith.constant 3.200000e+01 : f32
    %121 = vector.broadcast %cst_55 : f32 to vector<16x1xf32>
    %122 = arith.divf %120, %121 : vector<16x1xf32>
    %123 = vector.broadcast %122 : vector<16x1xf32> to vector<16x32xf32>
    %124 = arith.subf %118, %123 : vector<16x32xf32>
    %125 = arith.mulf %124, %124 : vector<16x32xf32>
    %cst_56 = arith.constant dense<0.000000e+00> : vector<16xf32>
    %126 = vector.multi_reduction <add>, %125, %cst_56 [1] : vector<16x32xf32> to vector<16xf32>
    %127 = vector.shape_cast %126 : vector<16xf32> to vector<16x1xf32>
    %cst_57 = arith.constant 3.200000e+01 : f32
    %128 = vector.broadcast %cst_57 : f32 to vector<16x1xf32>
    %129 = arith.divf %127, %128 : vector<16x1xf32>
    %130 = vector.broadcast %122 : vector<16x1xf32> to vector<16x32xf32>
    %131 = arith.subf %118, %130 : vector<16x32xf32>
    %cst_58 = arith.constant 9.99999974E-6 : f32
    %132 = vector.broadcast %cst_58 : f32 to vector<16x1xf32>
    %133 = arith.addf %129, %132 : vector<16x1xf32>
    %134 = math.rsqrt %133 : vector<16x1xf32>
    %135 = vector.broadcast %134 : vector<16x1xf32> to vector<16x32xf32>
    %136 = arith.mulf %131, %135 : vector<16x32xf32>
    %137 = vector.broadcast %10 : vector<1x32xf32> to vector<16x32xf32>
    %138 = arith.mulf %136, %137 : vector<16x32xf32>
    %139 = vector.broadcast %11 : vector<1x32xf32> to vector<16x32xf32>
    %140 = arith.addf %138, %139 : vector<16x32xf32>
    %c0_59 = arith.constant 0 : index
    %c0_60 = arith.constant 0 : index
    %141 = vector.load %arg10[%c0_59, %c0_60] : memref<16x32xf32, #tpu.memory_space<vmem>>, vector<16x32xf32>
    tpu.vector_store %arg10[%c0_59, %c0_60], %140 {strides = array<i32>} : memref<16x32xf32, #tpu.memory_space<vmem>>, vector<16x32xf32>,
    return
  }
  func.func @transform_0(%arg0: i32) -> (i32, i32) {
    %c0_i32 = arith.constant 0 : i32
    %c0_i32_0 = arith.constant 0 : i32
    %c0_i32_1 = arith.constant 0 : i32
    return %c0_i32, %c0_i32_0 : i32, i32
  }
  func.func @transform_1(%arg0: i32) -> (i32, i32, i32) {
    %c0_i32 = arith.constant 0 : i32
    %c0_i32_0 = arith.constant 0 : i32
    %c0_i32_1 = arith.constant 0 : i32
    %c0_i32_2 = arith.constant 0 : i32
    return %c0_i32, %c0_i32_0, %c0_i32_1 : i32, i32, i32
  }
  func.func @transform_2(%arg0: i32) -> (i32, i32, i32) {
    %c0_i32 = arith.constant 0 : i32
    %c0_i32_0 = arith.constant 0 : i32
    %c0_i32_1 = arith.constant 0 : i32
    return %arg0, %c0_i32, %c0_i32_0 : i32, i32, i32
  }
  func.func @transform_3(%arg0: i32) -> (i32, i32, i32) {
    %c0_i32 = arith.constant 0 : i32
    %c0_i32_0 = arith.constant 0 : i32
    %c0_i32_1 = arith.constant 0 : i32
    return %arg0, %c0_i32, %c0_i32_0 : i32, i32, i32
  }
  func.func @transform_4(%arg0: i32) -> (i32, i32, i32) {
    %c0_i32 = arith.constant 0 : i32
    %c0_i32_0 = arith.constant 0 : i32
    %c0_i32_1 = arith.constant 0 : i32
    return %arg0, %c0_i32, %c0_i32_0 : i32, i32, i32
  }
  func.func @transform_5(%arg0: i32) -> (i32, i32, i32) {
    %c0_i32 = arith.constant 0 : i32
    %c0_i32_0 = arith.constant 0 : i32
    %c0_i32_1 = arith.constant 0 : i32
    return %arg0, %c0_i32, %c0_i32_0 : i32, i32, i32
  }
  func.func @transform_6(%arg0: i32) -> (i32, i32, i32) {
    %c0_i32 = arith.constant 0 : i32
    %c0_i32_0 = arith.constant 0 : i32
    %c0_i32_1 = arith.constant 0 : i32
    return %arg0, %c0_i32, %c0_i32_0 : i32, i32, i32
  }
  func.func @transform_7(%arg0: i32) -> (i32, i32, i32) {
    %c0_i32 = arith.constant 0 : i32
    %c0_i32_0 = arith.constant 0 : i32
    %c0_i32_1 = arith.constant 0 : i32
    return %arg0, %c0_i32, %c0_i32_0 : i32, i32, i32
  }
  func.func @transform_8(%arg0: i32) -> (i32, i32, i32) {
    %c0_i32 = arith.constant 0 : i32
    %c0_i32_0 = arith.constant 0 : i32
    %c0_i32_1 = arith.constant 0 : i32
    return %arg0, %c0_i32, %c0_i32_0 : i32, i32, i32
  }
  func.func @transform_9(%arg0: i32) -> (i32, i32) {
    %c0_i32 = arith.constant 0 : i32
    %c0_i32_0 = arith.constant 0 : i32
    %c0_i32_1 = arith.constant 0 : i32
    return %c0_i32, %c0_i32_0 : i32, i32
  }
}

</mosaic_0001>

<bundles_post_ra>
// kernel: tpu_custom_call.1
= control target key start
LH: loop header
LB: loop body
LE: loop exit
PB: predicated region body
PF: predicated region fallthrough
CT: control target
= control target key end

     0   :  { %s2643_s0 = inlined_call_operand.hbm [shape: f32[16,32], index: 0, kind: input, shape index: {}]   ;;  %s2644_s1 = inlined_call_operand.vmem [shape: f32[2,1,8], index: 1, kind: input, shape index: {}]   ;;  %s2645_s2 = inlined_call_operand.vmem [shape: f32[2,32,96], index: 2, kind: input, shape index: {}]   ;;  %s2646_s3 = inlined_call_operand.hbm [shape: f32[2,1,96], index: 3, kind: input, shape index: {}]   ;;  %s2647_s4 = inlined_call_operand.vmem [shape: f32[2,32,32], index: 4, kind: input, shape index: {}]   ;;  %s2648_s5 = inlined_call_operand.vmem [shape: f32[2,32,64], index: 5, kind: input, shape index: {}]   ;;  %s2649_s6 = inlined_call_operand.vmem [shape: f32[2,1,64], index: 6, kind: input, shape index: {}]   ;;  %s2650_s7 = inlined_call_operand.vmem [shape: f32[2,64,32], index: 7, kind: input, shape index: {}]   ;;  %s2651_s8 = inlined_call_operand.vmem [shape: f32[2,8,32], index: 8, kind: input, shape index: {}]   ;;  %s2652_s9 = inlined_call_operand.hbm [shape: f32[16,32], index: 9, kind: output, shape index: {}]  }
   0x1   :  { %2659 = sst [smem:[#allocation13_spill]] %s2652_s9 }
   0x2   :  { %14 = vsyncpa [#allocation4], 0 }
   0x3   :  { %15 = vsyncpa [#allocation7], 0 }
   0x4   :  { %17 = vsyncpa [#allocation7 + $0x1], 0 }
   0x5   :  { %18 = vsyncpa [#allocation5], 0  ;;  %s2301_s30 = smov 0   ;;  %s2303_s10 = smov 0  }
   0x6   :  { %s2305_s11 = smov 0   ;;  %s2307_s12 = smov 0  }
   0x7 LB: > { %s2320_s13 = sadd.s32 4294967295, %s2234_s12   ;;  %p112_p0 = scmp.ne.s32.totalorder %s2226_s10, %s2222_s30  ;;  %s2234_s12 = sphi %s2307_s12, %s2672_s12   ;;  %s2230_s11 = sphi %s2305_s11, %s2675_s11   ;;  %s2226_s10 = sphi %s2303_s10, %s2674_s10   ;;  %s2222_s30 = sphi %s2301_s30, %s2673_s30  }
   0x8   : > { %p2653_p1 = scmp.eq.s32.totalorder %s2320_s13, 0  ;;  %p1781_p2 = scmp.ge.s32.totalorder %s2234_s12, 1 }
   0x9   : > { %p274_p3 = scmp.lt.s32.totalorder %s2234_s12, 3  ;;  %s2236_s16 = smov [#allocation3]  }
   0xa   : > { %p2329_p5 = por %p2653_p1, %p112_p0  ;;  %s286_s17 = sshll.u32 %s2236_s16, 4  ;;  %s287_s17 = int_to_ptr.vmem [resolvable:$true] %s286_s17 }
   0xb   : > { %p2333_p6 = pnand %p1781_p2, %p274_p3  ;;  %s2346_s19 = sadd.s32 1, %s2234_s12  }
   0xc   : > { %s2660_s14 = scalar_select %p2329_p5, 1, 0 }
   0xd   : > { %s2661_s15 = scalar_select %p2333_p6, 1, 0 }
   0xe   : > { %p2017_p7 = pneg %p2333_p6  ;;  %2663 = sst [smem:[#allocation12_spill]] %s2346_s19 }
   0xf   : > { %s99_s20 = sadd.s32 1, %s2230_s11  ;;  %s96_s21 = ssub.s32 %s2234_s12, %s2346_s19 }
  0x10   : > { %p2341_p8 = pnand %p2017_p7, %p2653_p1  ;;  %s2108_s24 = scalar_lea.hbm %s2643_s0, 256 }
  0x11   : > { %p2109_p9 = scmp.ne.s32.totalorder %s2643_s0, %s2108_s24  ;;  %p2115_p13 = scmp.lt.u32.totalorder %s2108_s24, %s2643_s0 }
  0x12   : > { %p2110_p10 = pneg %p2341_p8 }
  0x14   : > { %p2111_p11 = pnand %p2110_p10, %p2109_p9 }
  0x16   : > { %p2112_p12 = pneg %p2111_p11 }
  0x18   : > { %p2117_p0 = pnand %p2115_p13, %p2112_p12 }
  0x1a   : > { %2120 = shalt.err (!%p2117_p0)
}
  0x1b   : > { %s2121_s29 = scalar_lea.vmem %s287_s17, 256  ;;  %p2129_p4 = scmp.lt.s32.totalorder %s287_s17, %s287_s17 }
  0x1c   : > { %p2122_p2 = scmp.ne.s32.totalorder %s287_s17, %s2121_s29  ;;  %p2130_p1 = scmp.lt.s32.totalorder %s2121_s29, %s2121_s29 }
  0x1e   : > { %p2124_p3 = pnand %p2122_p2, %p2110_p10  ;;  %p2131_p5 = por %p2130_p1, %p2129_p4 }
  0x20   : > { %p2125_p7 = pneg %p2124_p3 }
  0x22   : > { %p2132_p6 = pnand %p2131_p5, %p2125_p7 }
  0x24   : > { %2135 = shalt.err (!%p2132_p6)
}
  0x25   : > { %s2237_s30 = smov 128   ;;  %s2238_s16 = smov 8  }
  0x26   : > { %2020 = dma.hbm_to_vmem [thread:$0]  (!%p2341_p8), %s2643_s0, 256, %s287_s17, [#allocation4], %s2237_s30, %s2237_s30, %s2238_s16  }
  0x27   : > { %p97_p9 = scmp.eq.s32.totalorder %s96_s21, 0  ;;  %p106_p10 = scmp.ne.s32.totalorder %s2230_s11, %s2226_s10 }
  0x28   : > { %p107_p1 = scmp.eq.s32.totalorder %s2234_s12, 0  ;;  %p2026_p4 = scmp.lt.s32.totalorder %s2234_s12, 2 }
  0x29   : > { %s2372_s24 = scalar_select %p97_p9, %s2230_s11, %s99_s20  }
  0x2a   : > { %p108_p5 = por %p107_p1, %p106_p10  ;;  %s311_s25 = sand.u32 1, %s2230_s11  }
  0x2b   : > { %s1784_s26 = sshll.u32 %s2234_s12, 4  ;;  %s314_s27 = scalar_lea.vmem [#allocation6], %s311_s25 }
  0x2c   : > { %s321_s28 = sshll.u32 %s314_s27, 4  ;;  %s2379_s9 = scalar_lea.hbm %s2646_s3, %s1784_s26  ;;  %s2381_s28 = int_to_ptr.vmem [resolvable:$true] %s321_s28 }
  0x2d   : > { %p2383_p6 = pnand %p2026_p4, %p108_p5  ;;  %s312_s12 = scalar_lea.sflag [#allocation7], %s311_s25 }
  0x2e   : > { %s2136_s18 = scalar_lea.hbm %s2379_s9, 16  ;;  %s2141_s21 = scalar_lea.hbm %s2646_s3, 32 }
  0x2f   : > { %p2137_p8 = scmp.ne.s32.totalorder %s2379_s9, %s2136_s18  ;;  %p2138_p11 = pneg %p2383_p6 }
  0x30   : > { %p2142_p0 = scmp.lt.u32.totalorder %s2379_s9, %s2646_s3  ;;  %p2143_p2 = scmp.lt.u32.totalorder %s2141_s21, %s2136_s18 }
  0x31   : > { %p2139_p12 = pnand %p2138_p11, %p2137_p8  ;;  %p2145_p7 = scmp.lt.u32.totalorder %s2136_s18, %s2379_s9 }
  0x32   : > { %p2144_p3 = por %p2143_p2, %p2142_p0 }
  0x33   : > { %p2140_p13 = pneg %p2139_p12 }
  0x34   : > { %p2146_p9 = por %p2145_p7, %p2144_p3 }
  0x36   : > { %p2147_p10 = pnand %p2146_p9, %p2140_p13 }
  0x38   : > { %2150 = shalt.err (!%p2147_p10)
}
  0x39   : > { %s2151_s22 = scalar_lea.vmem %s2381_s28, 16  ;;  %s2239_s23 = smov [#allocation6]  }
  0x3a   : > { %p2152_p1 = scmp.ne.s32.totalorder %s2381_s28, %s2151_s22  ;;  %s2156_s25 = sshll.u32 %s2239_s23, 4  ;;  %s2157_s25 = int_to_ptr.vmem [resolvable:$false] %s2156_s25 }
  0x3b   : > { %s2158_s26 = scalar_lea.vmem %s2157_s25, 32  ;;  %p2159_p8 = scmp.lt.s32.totalorder %s2381_s28, %s2157_s25 }
  0x3c   : > { %p2154_p4 = pnand %p2152_p1, %p2138_p11  ;;  %p2160_p12 = scmp.lt.s32.totalorder %s2158_s26, %s2151_s22 }
  0x3e   : > { %p2155_p5 = pneg %p2154_p4  ;;  %p2161_p0 = por %p2160_p12, %p2159_p8 }
  0x40   : > { %p2162_p2 = pnand %p2161_p0, %p2155_p5 }
  0x42   : > { %2165 = shalt.err (!%p2162_p2)
}
  0x43   : > { %2024 = dma.hbm_to_vmem [thread:$0]  (!%p2383_p6), %s2379_s9, 16, %s2381_s28, %s312_s12  }
  0x44   : > { %p2665_p13 = scmp.ne.s32.totalorder %s2661_s15, 0 }
  0x45   : > { %p2666_p11 = scmp.eq.s32.totalorder (!%p2665_p13), %s2320_s13, 0 }
  0x46   : > { %367 = sbr.rel (%p2665_p13) target bundleno = 3140 (0xc44), region = 56 }
  0x4d   : > { %2209 = dma.done.wait (%p2666_p11), [#allocation4], 256   ;;  %p2667_p3 = pmov %p2666_p11 }
  0x4e   : > { %s373_s27 = sand.u32 1, %s2226_s10   ;;  %p2668_p7 = scmp.ne.s32.totalorder %s2660_s14, 0 }
  0x4f   : > { %2211 = vsyncadd (%p2667_p3), [#allocation4], 4294967040  ;;  %s374_s29 = scalar_lea.sflag [#allocation7], %s373_s27  ;;  %s2419_s18 = scalar_lea.vmem [#allocation6], %s373_s27 }
  0x50   : > { %2213 = dma.done.wait (%p2668_p7), %s374_s29, 16  }
  0x51   : > { %2215 = vsyncadd (%p2668_p7), %s374_s29, 4294967280  ;;  %p432_p6 = scmp.lt.s32.totalorder %s2320_s13, 1  ;;  %p2669_p9 = scmp.ne.s32.totalorder %s2320_s13, 0 }
  0x52   : > { %v463_v0 = vld [vmem:[#allocation3] sm:$0xff] (!%p2669_p9)  ;;  %vm465_vm0 = vcmask (!%p2669_p9), 261120   ;;  %v464_v1 = vld [vmem:[#allocation3 + $0x8] sm:$0xff] (!%p2669_p9) }
  0x53   : > { %s2427_s9 = scalar_select %p432_p6, %s2320_s13, 1 }
  0x54   : > { %462 = sbr.rel (%p2669_p9) target bundleno = 91 (0x5b), region = 68  ;;  %466 = vst.msk [vmem:[#allocation8] sm:$0xff] (!%p2669_p9), %vm465_vm0, %v463_v0  ;;  %467 = vst.msk [vmem:[#allocation8 + $0x8] sm:$0xff] (!%p2669_p9), %vm465_vm0, %v464_v1 }
  0x55   : > { %s1827_s15 = sshll.u32 %s2427_s9, 5  ;;  %s1830_s26 = sshll.u32 %s2427_s9, 6 }
  0x56   : > { %s436_s21 = scalar_lea.vmem %s2645_s2, %s1827_s15  ;;  %s2440_s16 = scalar_lea.vmem %s2647_s4, %s1827_s15 }
  0x57   : > { %s2445_s25 = scalar_lea.vmem %s2648_s5, %s1827_s15  ;;  %s2451_s28 = scalar_lea.vmem %s2650_s7, %s1830_s26 }
  0x58   : > { %s1795_s17 = sshll.u32 %s2427_s9, 3 }
  0x59   : > { %s2457_s20 = scalar_lea.vmem %s2651_s8, %s1795_s17 }
  0x5b PF: > { %v473_v2 = vld [vmem:[%s436_s21] sm:$0xff]  ;;  %v474_v3 = vld [vmem:[%s436_s21 + $0x8] sm:$0xff]  ;;  %v475_v4 = vld [vmem:[%s436_s21 + $0x10] sm:$0xff]  ;;  %vm484_vm1 = vcmask 261120   ;;  %v2240_v10 = vmov 0.0   ;;  %vm2241_vm2 = vmmov 0   ;;  %s2670_s29 = scalar_lea.vmem %s2649_s6, %s2427_s9 }
  0x5c   : > { %v1967_v5 = vpack.c.bf16 %v474_v3, %v473_v2  ;;  %v476_v6 = vld [vmem:[%s436_s21 + $0x18] sm:$0xff]  ;;  %v2461_v7 = vld [vmem:[#allocation8] sm:$0xff]  ;;  %v2465_v9 = vld [vmem:[#allocation8 + $0x8] sm:$0xff]  ;;  %1896 = vmatprep.subr.mxu0 %v2240_v10  ;;  %1898 = vmatprep.mubr.msk.f32.mxu0 %vm2241_vm2, %v2240_v10  ;;  %s2242_s15 = smov 96   ;;  %vm583_vm3 = vcmask 130048   ;;  %vm737_vm4 = vcmask 64512  }
  0x5d   : > { %v1971_v8 = vpack.c.bf16 %v476_v6, %v475_v4  ;;  %1883 = vmatprep.mubr.msk.f32.mxu1 %vm484_vm1, %v2461_v7  ;;  %v1797_v11 = vld [vmem:[%s2419_s18] ss:$0 sm:$0xff]  ;;  %v2503_v24 = vld [vmem:[%s2644_s1 + $0x1] ss:$0 sm:$0xff]  ;;  %s2243_s30 = smov 64   ;;  %s2244_s22 = smov 80  }
  0x5e   : > { %1968 = vmatprep.subr.bf16.mxu1 %v1967_v5  ;;  %v2497_v20 = vld [vmem:[%s2644_s1] ss:$0 sm:$0xff]  ;;  %s2245_s23 = smov 112   ;;  %s2246_s26 = smov 48   ;;  %vm1252_vm5 = vcmask 261248   ;;  %vm1519_vm6 = vcmask 523264  }
  0x5f   : > { %1970 = vmatpush3.bf16.msra.mxu1 %v1967_v5  ;;  %s2247_s27 = smov 16   ;;  %s2248_s9 = smov [#allocation8]  }
  0x60   : > { %1972 = vmatprep.subr.bf16.mxu1 %v1971_v8  ;;  %p2028_p10 = scmp.eq.s32.totalorder %s2320_s13, 1 }
  0x63   : > { %1974 = vmatpush3.bf16.msra.mxu1 %v1971_v8 }
  0x64   : > { %1886 = vmatprep.subr.mxu1 %v2240_v10 }
  0x66   : > { %1884 = vmatmul.mubr.msk.f32.vlgmr.msra.gmra.mrb[0].mxu1 %vm484_vm1, %v2465_v9 }
  0x67   : > { %1888 = vmatprep.mubr.msk.f32.mxu1 %vm2241_vm2, %v2240_v10 }
 0x139   : > { %v1885_v12 = vpop.f32.mrb[0].mxu1 }
 0x13a   : > { %v557_v13 = vpop.f32.mrb[1].mxu1  ;;  %v2479_v15 = vadd.f32 %v1885_v12, %v1797_v11 }
 0x13b   : > { %v2476_v14 = vadd.f32 %v1797_v11, %v557_v13 }
 0x13c   : > { %v567_v19 = vmul.f32 0.25, %v2479_v15 }
 0x13d   : > { %581 = vrot.lane.b32.xlu0 %v2476_v14, %s2242_s15  ;;  %v566_v17 = vmul.f32 0.25, %v2476_v14 }
 0x141   : > { %660 = vrot.lane.b32.xlu0 %v2479_v15, %s2242_s15 }
 0x1af   : > { %v582_v16 = vpop.permute.xlu0 %581 }
 0x1b0   : > { %1887 = vmatpush3.xpose.msk.msra.mxu1 %vm583_vm3, %v582_v16 }
 0x1b1   : > { %1891 = vmatprep.subr.mxu1 %v2240_v10 }
 0x1b3   : > { %v661_v18 = vpop.permute.xlu0 %660  ;;  %1889 = vmatmul.mubr.msk.f32.vlgmr.msra.gmra.mrb[2].mxu1 %vm583_vm3, %v566_v17 }
 0x1b4   : > { %1892 = vmatpush3.xpose.msk.msra.mxu1 %vm583_vm3, %v661_v18  ;;  %1893 = vmatprep.mubr.msk.f32.mxu1 %vm2241_vm2, %v2240_v10 }
 0x1b5   : > { %1901 = vmatprep.subr.mxu1 %v2240_v10 }
 0x1b7   : > { %1894 = vmatmul.mubr.msk.f32.vlgmr.msra.gmra.mrb[4].mxu1 %vm583_vm3, %v567_v19 }
 0x1b8   : > { %1903 = vmatprep.mubr.msk.f32.mxu1 %vm2241_vm2, %v2240_v10 }
 0x286   : > { %v655_v21 = vpop.f32.mrb[2].mxu1 }
 0x287   : > { %v656_v22 = vadd.f32 %v2497_v20, %v655_v21  ;;  %v1890_v23 = vpop.f32.mrb[3].mxu1  ;;  %v1257_v21 = vld [vmem:[%s2440_s16] sm:$0xff] }
 0x289   : > { %v738_v25 = vsel %vm737_vm4, %v656_v22, -inf }
 0x28a   : > { %739 = vmax.xlane.f32.xlu1 %v738_v25  ;;  %v733_v26 = vpop.f32.mrb[4].mxu1 }
 0x28b   : > { %v734_v27 = vadd.f32 %v2503_v24, %v733_v26  ;;  %v1895_v28 = vpop.f32.mrb[5].mxu1 }
 0x28d   : > { %v741_v29 = vsel %vm737_vm4, %v734_v27, -inf }
 0x28e   : > { %742 = vmax.xlane.f32.xlu1 %v741_v29 }
 0x29f   : > { %760 = vrot.lane.b32.xlu1 %v2476_v14, %s2243_s30 }
 0x2a3   : > { %836 = vrot.lane.b32.xlu1 %v2479_v15, %s2243_s30 }
 0x2a7   : > { %916 = vrot.lane.b32.xlu1 %v2476_v14, %s2244_s22 }
 0x2ab   : > { %994 = vrot.lane.b32.xlu1 %v2479_v15, %s2244_s22 }
 0x317   : > { %v740_v30 = vpop.xlane.xlu1 %739 }
 0x318   : > { %v744_v31 = vsub.f32 %v656_v22, %v740_v30  ;;  %v1258_v22 = vld [vmem:[%s2440_s16 + $0x8] sm:$0xff] }
 0x319   : > { %v1975_v23 = vpack.c.bf16 %v1258_v22, %v1257_v21 }
 0x31a   : > { %v746_v32 = vmul.f32 1.442695, %v744_v31 }
 0x31b   : > { %v743_v33 = vpop.xlane.xlu1 %742 }
 0x31c   : > { %2076 = vpow2.f32 %v746_v32  ;;  %v745_v34 = vsub.f32 %v734_v27, %v743_v33 }
 0x31e   : > { %v748_v35 = vmul.f32 1.442695, %v745_v34  ;;  %v1261_v34 = vlaneseq }
 0x31f   : > { %v761_v36 = vpop.permute.xlu1 %760 }
 0x320   : > { %2078 = vpow2.f32 %v748_v35  ;;  %1897 = vmatpush3.msra.mxu0 %v761_v36  ;;  %v2550_v35 = vshrl.u32 %v1261_v34, 7 }
 0x321   : > { %1906 = vmatprep.subr.mxu0 %v2240_v10 }
 0x322   : > { %v1263_v36 = vsub.s32 0, %v2550_v35 }
 0x323   : > { %v837_v37 = vpop.permute.xlu1 %836 }
 0x324   : > { %1902 = vmatpush3.msra.mxu1 %v837_v37  ;;  %v2554_v37 = vld [vmem:[%s2457_s20] sm:$0xff] }
 0x325   : > { %1911 = vmatprep.subr.mxu1 %v2240_v10 }
 0x326   : > { %v2077_v38 = vpop.eup %2076 }
 0x327   : > { %v750_v39 = vsel %vm737_vm4, %v2077_v38, 0.0  ;;  %v917_v42 = vpop.permute.xlu1 %916 }
 0x328   : > { %751 = vadd.xlane.f32.xlu0 %v750_v39 }
 0x32a   : > { %v2079_v40 = vpop.eup %2078 }
 0x32b   : > { %v753_v41 = vsel %vm737_vm4, %v2079_v40, 0.0  ;;  %v995_v43 = vpop.permute.xlu1 %994 }
 0x32c   : > { %754 = vadd.xlane.f32.xlu1 %v753_v41 }
 0x33d   : > { %992 = vrot.lane.b32.xlu1 %v567_v19, %s2245_s23 }
 0x33e   : > { %914 = vrot.lane.b32.xlu0 %v566_v17, %s2245_s23 }
 0x3b5   : > { %v752_v44 = vpop.xlane.xlu0 %751 }
 0x3b6   : > { %2080 = vrcp.f32 %v752_v44 }
 0x3b9   : > { %v755_v45 = vpop.xlane.xlu1 %754  ;;  %v915_v50 = vpop.permute.xlu0 %914 }
 0x3ba   : > { %2082 = vrcp.f32 %v755_v45 }
 0x3bd   : > { %v993_v51 = vpop.permute.xlu1 %992 }
 0x3c0   : > { %v2081_v46 = vpop.eup %2080 }
 0x3c1   : > { %v758_v47 = vmul.f32 %v2081_v46, %v2077_v38  ;;  %v1264_v38 = vrot.slane %v2554_v37, %v1263_v36 }
 0x3c3   : > { %1899 = vmatmul.mubr.msk.f32.vlgmr.msra.gmra.mrb[0].mxu0 %vm737_vm4, %v758_v47 }
 0x3c4   : > { %v2083_v48 = vpop.eup %2082  ;;  %1907 = vmatpush3.xpose.msk.msra.mxu0 %vm583_vm3, %v917_v42  ;;  %1908 = vmatprep.mubr.msk.f32.mxu0 %vm2241_vm2, %v2240_v10 }
 0x3c5   : > { %v759_v49 = vmul.f32 %v2083_v48, %v2079_v40  ;;  %1916 = vmatprep.subr.mxu0 %v2240_v10 }
 0x3c7   : > { %1904 = vmatmul.mubr.msk.f32.vlgmr.msra.gmra.mrb[6].mxu1 %vm737_vm4, %v759_v49  ;;  %1909 = vmatmul.mubr.msk.f32.vlgmr.msra.gmra.mrb[2].mxu0 %vm583_vm3, %v915_v50 }
 0x3c8   : > { %1912 = vmatpush3.xpose.msk.msra.mxu1 %vm583_vm3, %v995_v43  ;;  %1913 = vmatprep.mubr.msk.f32.mxu1 %vm2241_vm2, %v2240_v10 }
 0x3c9   : > { %1921 = vmatprep.subr.mxu1 %v2240_v10  ;;  %1918 = vmatprep.mubr.msk.f32.mxu0 %vm2241_vm2, %v2240_v10 }
 0x3cb   : > { %1914 = vmatmul.mubr.msk.f32.vlgmr.msra.gmra.mrb[8].mxu1 %vm583_vm3, %v993_v51 }
 0x3cc   : > { %1923 = vmatprep.mubr.msk.f32.mxu1 %vm2241_vm2, %v2240_v10 }
 0x496   : > { %v832_v52 = vpop.f32.mrb[0].mxu0 }
 0x497   : > { %912 = vst.msk [vmem:[#allocation2] sm:$0xff] %vm583_vm3, %v832_v52  ;;  %v1900_v53 = vpop.f32.mrb[1].mxu0 }
 0x49a   : > { %v908_v54 = vpop.f32.mrb[6].mxu1  ;;  %v988_v55 = vpop.f32.mrb[2].mxu0 }
 0x49b   : > { %913 = vst.msk [vmem:[#allocation2 + $0x8] sm:$0xff] %vm583_vm3, %v908_v54  ;;  %v989_v56 = vadd.f32 %v2497_v20, %v988_v55  ;;  %v1905_v57 = vpop.f32.mrb[7].mxu1  ;;  %v1910_v58 = vpop.f32.mrb[3].mxu0  ;;  %v1411_v55 = vld [vmem:[%s2445_s25] sm:$0xff] }
 0x49c   : > { %v1413_v58 = vld [vmem:[%s2445_s25 + $0x10] sm:$0xff] }
 0x49d   : > { %v1070_v59 = vsel %vm737_vm4, %v989_v56, -inf }
 0x49e   : > { %1071 = vmax.xlane.f32.xlu1 %v1070_v59  ;;  %v1066_v60 = vpop.f32.mrb[8].mxu1  ;;  %v1414_v59 = vld [vmem:[%s2445_s25 + $0x18] sm:$0xff] }
 0x49f   : > { %v1067_v61 = vadd.f32 %v2503_v24, %v1066_v60  ;;  %v1915_v62 = vpop.f32.mrb[9].mxu1  ;;  %v1260_v24 = vld [vmem:[%s2440_s16 + $0x18] sm:$0xff]  ;;  %v1987_v60 = vpack.c.bf16 %v1414_v59, %v1413_v58 }
 0x4a1   : > { %v1073_v63 = vsel %vm737_vm4, %v1067_v61, -inf }
 0x4a2   : > { %1074 = vmax.xlane.f32.xlu0 %v1073_v63 }
 0x4b8   : > { %1168 = vrot.lane.b32.xlu0 %v2479_v15, %s2246_s26 }
 0x52b   : > { %v1072_v0 = vpop.xlane.xlu1 %1071 }
 0x52c   : > { %v1076_v1 = vsub.f32 %v989_v56, %v1072_v0  ;;  %v1412_v56 = vld [vmem:[%s2445_s25 + $0x8] sm:$0xff] }
 0x52d   : > { %v1983_v57 = vpack.c.bf16 %v1412_v56, %v1411_v55 }
 0x52e   : > { %v1078_v2 = vmul.f32 1.442695, %v1076_v1 }
 0x52f   : > { %v1075_v3 = vpop.xlane.xlu0 %1074 }
 0x530   : > { %2084 = vpow2.f32 %v1078_v2  ;;  %v1077_v4 = vsub.f32 %v1067_v61, %v1075_v3  ;;  %v1377_v3 = vsub.s32 2, %v2550_v35 }
 0x532   : > { %v1080_v5 = vmul.f32 1.442695, %v1077_v4  ;;  %v1383_v4 = vsub.s32 3, %v2550_v35 }
 0x533   : > { %v1169_v6 = vpop.permute.xlu0 %1168 }
 0x534   : > { %2086 = vpow2.f32 %v1080_v5  ;;  %1922 = vmatpush3.msra.mxu1 %v1169_v6  ;;  %v1378_v5 = vrot.slane %v2554_v37, %v1377_v3  ;;  %v1389_v6 = vsub.s32 6, %v2550_v35 }
 0x535   : > { %1984 = vmatprep.subr.bf16.mxu1 %v1983_v57 }
 0x53a   : > { %v2085_v8 = vpop.eup %2084 }
 0x53b   : > { %v1082_v10 = vsel %vm737_vm4, %v2085_v8, 0.0 }
 0x53c   : > { %1083 = vadd.xlane.f32.xlu1 %v1082_v10 }
 0x53e   : > { %v2087_v11 = vpop.eup %2086 }
 0x53f   : > { %v1085_v12 = vsel %vm737_vm4, %v2087_v11, 0.0 }
 0x540   : > { %1086 = vadd.xlane.f32.xlu1 %v1085_v12 }
 0x551   : > { %1092 = vrot.lane.b32.xlu1 %v2476_v14, %s2246_s26  ;;  %v1259_v14 = vld [vmem:[%s2440_s16 + $0x10] sm:$0xff] }
 0x552   : > { %v1979_v25 = vpack.c.bf16 %v1260_v24, %v1259_v14  ;;  %v1507_v14 = vld [vmem:[%s2451_s28] sm:$0xff]  ;;  %v1508_v24 = vld [vmem:[%s2451_s28 + $0x8] sm:$0xff] }
 0x5c9   : > { %v1084_v13 = vpop.xlane.xlu1 %1083 }
 0x5ca   : > { %2088 = vrcp.f32 %v1084_v13  ;;  %v1390_v13 = vrot.slane %v2554_v37, %v1389_v6 }
 0x5cd   : > { %v1087_v15 = vpop.xlane.xlu1 %1086 }
 0x5ce   : > { %2090 = vrcp.f32 %v1087_v15 }
 0x5d1   : > { %v1093_v16 = vpop.permute.xlu1 %1092 }
 0x5d2   : > { %1917 = vmatpush3.msra.mxu0 %v1093_v16 }
 0x5d3   : > { %1976 = vmatprep.subr.bf16.mxu0 %v1975_v23 }
 0x5d4   : > { %v2089_v17 = vpop.eup %2088 }
 0x5d5   : > { %v1090_v18 = vmul.f32 %v2089_v17, %v2085_v8 }
 0x5d7   : > { %1919 = vmatmul.mubr.msk.f32.vlgmr.msra.gmra.mrb[4].mxu0 %vm737_vm4, %v1090_v18 }
 0x5d8   : > { %v2091_v19 = vpop.eup %2090  ;;  %1978 = vmatpush3.bf16.msra.mxu0 %v1975_v23 }
 0x5d9   : > { %v1091_v20 = vmul.f32 %v2091_v19, %v2087_v11  ;;  %1980 = vmatprep.subr.bf16.mxu0 %v1979_v25  ;;  %v1384_v11 = vrot.slane %v2554_v37, %v1383_v4 }
 0x5db   : > { %1924 = vmatmul.mubr.msk.f32.vlgmr.msra.gmra.mrb[10].mxu1 %vm737_vm4, %v1091_v20 }
 0x5dc   : > { %1982 = vmatpush3.bf16.msra.mxu0 %v1979_v25  ;;  %1986 = vmatpush3.bf16.msra.mxu1 %v1983_v57  ;;  %v1509_v25 = vld [vmem:[%s2451_s28 + $0x10] sm:$0xff] }
 0x5dd   : > { %1988 = vmatprep.subr.bf16.mxu1 %v1987_v60 }
 0x5e0   : > { %1990 = vmatpush3.bf16.msra.mxu1 %v1987_v60 }
 0x6aa   : > { %v1164_v26 = vpop.f32.mrb[4].mxu0 }
 0x6ab   : > { %1246 = vrot.lane.b32.xlu1 %v1164_v26, %s2247_s27  ;;  %v1920_v27 = vpop.f32.mrb[5].mxu0  ;;  %v1991_v26 = vpack.c.bf16 %v1508_v24, %v1507_v14 }
 0x6ac   : > { %v1510_v27 = vld [vmem:[%s2451_s28 + $0x18] sm:$0xff] }
 0x6ad   : > { %1992 = vmatprep.subr.bf16.mxu0 %v1991_v26 }
 0x6ae   : > { %v1240_v28 = vpop.f32.mrb[10].mxu1 }
 0x6af   : > { %1248 = vrot.lane.b32.xlu1 %v1240_v28, %s2247_s27  ;;  %v1925_v29 = vpop.f32.mrb[11].mxu1  ;;  %v1995_v28 = vpack.c.bf16 %v1510_v27, %v1509_v25 }
 0x6b0   : > { %v1511_v29 = vld [vmem:[%s2451_s28 + $0x20] sm:$0xff] }
 0x71d   : > { %v1247_v30 = vpop.permute.xlu1 %1246 }
 0x71e   : > { %1253 = vst.msk [vmem:[#allocation2] sm:$0xff] %vm1252_vm5, %v1247_v30  ;;  %v1512_v30 = vld [vmem:[%s2451_s28 + $0x28] sm:$0xff] }
 0x721   : > { %v1249_v31 = vpop.permute.xlu1 %1248 }
 0x722   : > { %1254 = vst.msk [vmem:[#allocation2 + $0x8] sm:$0xff] %vm1252_vm5, %v1249_v31  ;;  %v1999_v31 = vpack.c.bf16 %v1512_v30, %v1511_v29 }
 0x725   : > { %v1255_v32 = vld [vmem:[#allocation2] sm:$0xff] }
 0x726   : > { %1934 = vmatprep.mubr.msk.f32.mxu0 %vm484_vm1, %v1255_v32  ;;  %v1513_v32 = vld [vmem:[%s2451_s28 + $0x30] sm:$0xff] }
 0x729   : > { %v1256_v33 = vld [vmem:[#allocation2 + $0x8] sm:$0xff] }
 0x72a   : > { %1935 = vmatmul.mubr.msk.f32.vlgmr.msra.gmra.mrb[6].mxu0 %vm484_vm1, %v1256_v33  ;;  %v1514_v33 = vld [vmem:[%s2451_s28 + $0x38] sm:$0xff]  ;;  %s1649_s28 = sshll.u32 %s2248_s9, 4  ;;  %s1650_s28 = int_to_ptr.vmem [resolvable:$true] %s1649_s28 }
 0x72b   : > { %1994 = vmatpush3.bf16.msra.mxu0 %v1991_v26  ;;  %v2003_v34 = vpack.c.bf16 %v1514_v33, %v1513_v32  ;;  %s2166_s17 = scalar_lea.vmem %s1650_s28, 256  ;;  %p2173_p8 = scmp.lt.s32.totalorder %s1650_s28, %s1650_s28 }
 0x72c   : > { %1996 = vmatprep.subr.bf16.mxu0 %v1995_v28  ;;  %p2167_p1 = scmp.ne.s32.totalorder %s1650_s28, %s2166_s17  ;;  %p2174_p12 = scmp.lt.s32.totalorder %s2166_s17, %s2166_s17 }
 0x72e   : > { %p2168_p4 = pnand %p2167_p1, %p2028_p10  ;;  %p2175_p0 = por %p2174_p12, %p2173_p8 }
 0x72f   : > { %1998 = vmatpush3.bf16.msra.mxu0 %v1995_v28 }
 0x730   : > { %2000 = vmatprep.subr.bf16.mxu0 %v1999_v31  ;;  %p2169_p5 = pneg %p2168_p4 }
 0x732   : > { %p2176_p2 = pnand %p2175_p0, %p2169_p5 }
 0x733   : > { %2002 = vmatpush3.bf16.msra.mxu0 %v1999_v31 }
 0x734   : > { %2004 = vmatprep.subr.bf16.mxu0 %v2003_v34 }
 0x737   : > { %2006 = vmatpush3.bf16.msra.mxu0 %v2003_v34 }
 0x7fd   : > { %v1936_v39 = vpop.f32.mrb[6].mxu0 }
 0x7fe   : > { %v1343_v40 = vadd.f32 %v1936_v39, %v1264_v38  ;;  %v1337_v41 = vpop.f32.mrb[7].mxu0 }
 0x7ff   : > { %v1338_v42 = vadd.f32 %v1337_v41, %v1264_v38 }
 0x800   : > { %v1347_v43 = vadd.f32 %v1343_v40, %v2465_v9 }
 0x801   : > { %v1346_v44 = vadd.f32 %v1338_v42, %v2461_v7 }
 0x802   : > { %v1351_v45 = vsel %vm484_vm1, %v1347_v43, 0.0 }
 0x803   : > { %1352 = vadd.xlane.f32.xlu1 %v1351_v45  ;;  %v1348_v46 = vsel %vm484_vm1, %v1346_v44, 0.0  ;;  %v1818_v45 = vld [vmem:[%s2670_s29] ss:$0 sm:$0xff] }
 0x804   : > { %1349 = vadd.xlane.f32.xlu0 %v1348_v46 }
 0x890   : > { %v1353_v47 = vpop.xlane.xlu1 %1352 }
 0x891   : > { %v1356_v48 = vmul.f32 0.03125, %v1353_v47  ;;  %v1350_v49 = vpop.xlane.xlu0 %1349 }
 0x892   : > { %v1355_v50 = vmul.f32 0.03125, %v1350_v49 }
 0x893   : > { %v1358_v51 = vsub.f32 %v1347_v43, %v1356_v48 }
 0x894   : > { %v1357_v52 = vsub.f32 %v1346_v44, %v1355_v50 }
 0x895   : > { %v1360_v7 = vmul.f32 %v1358_v51, %v1358_v51 }
 0x896   : > { %v1359_v53 = vmul.f32 %v1357_v52, %v1357_v52 }
 0x897   : > { %v1364_v54 = vsel %vm484_vm1, %v1360_v7, 0.0 }
 0x898   : > { %v1361_v9 = vsel %vm484_vm1, %v1359_v53, 0.0 }
 0x899   : > { %1362 = vadd.xlane.f32.xlu0 %v1361_v9 }
 0x89d   : > { %1365 = vadd.xlane.f32.xlu0 %v1364_v54  ;;  %v1517_v54 = vsub.s32 1, %v2550_v35 }
 0x89f   : > { %v1518_v55 = vrot.slane %v2554_v37, %v1517_v54 }
 0x926   : > { %v1363_v61 = vpop.xlane.xlu0 %1362 }
 0x927   : > { %v1367_v62 = vmul.f32 0.03125, %v1363_v61 }
 0x929   : > { %v1369_v63 = vadd.f32 1e-05, %v1367_v62 }
 0x92a   : > { %v1366_v0 = vpop.xlane.xlu0 %1365 }
 0x92b   : > { %2092 = vrsqrt.f32 %v1369_v63  ;;  %v1368_v1 = vmul.f32 0.03125, %v1366_v0 }
 0x92d   : > { %v1370_v2 = vadd.f32 1e-05, %v1368_v1 }
 0x92f   : > { %2094 = vrsqrt.f32 %v1370_v2 }
 0x935   : > { %v2093_v8 = vpop.eup %2092 }
 0x936   : > { %v1373_v10 = vmul.f32 %v2093_v8, %v1357_v52 }
 0x938   : > { %v1379_v12 = vmul.f32 %v1378_v5, %v1373_v10 }
 0x939   : > { %v2095_v15 = vpop.eup %2094 }
 0x93a   : > { %v1374_v16 = vmul.f32 %v2095_v15, %v1358_v51  ;;  %v2573_v17 = vadd.f32 %v1384_v11, %v1379_v12 }
 0x93c   : > { %v1380_v18 = vmul.f32 %v1378_v5, %v1374_v16  ;;  %1945 = vmatprep.mubr.msk.f32.mxu1 %vm484_vm1, %v2573_v17  ;;  %v1391_v19 = vmul.f32 %v1390_v13, %v2573_v17 }
 0x93e   : > { %v1386_v20 = vadd.f32 %v1384_v11, %v1380_v18  ;;  %v1393_v21 = vsel %vm484_vm1, %v1391_v19, 0.0  ;;  %v1631_v19 = vsub.s32 4, %v2550_v35 }
 0x93f   : > { %1394 = vadd.xlane.f32.xlu1 %v1393_v21 }
 0x940   : > { %1946 = vmatmul.mubr.msk.f32.vlgmr.msra.gmra.mrb[12].mxu1 %vm484_vm1, %v1386_v20  ;;  %v1392_v22 = vmul.f32 %v1390_v13, %v1386_v20  ;;  %v1632_v21 = vrot.slane %v2554_v37, %v1631_v19 }
 0x942   : > { %v1396_v23 = vsel %vm484_vm1, %v1392_v22, 0.0 }
 0x943   : > { %1397 = vadd.xlane.f32.xlu0 %v1396_v23 }
 0x9cc   : > { %v1395_v38 = vpop.xlane.xlu1 %1394 }
 0x9cd   : > { %v1816_v40 = vmul.f32 -1.442695, %v1395_v38 }
 0x9d0   : > { %v1398_v36 = vpop.xlane.xlu0 %1397 }
 0x9d1   : > { %v1817_v39 = vmul.f32 -1.442695, %v1398_v36 }
 0x9d3   : > { %2096 = vpow2.f32 %v1817_v39 }
 0x9d4   : > { %2098 = vpow2.f32 %v1816_v40 }
 0x9dd   : > { %v2097_v41 = vpop.eup %2096 }
 0x9de   : > { %v2099_v42 = vpop.eup %2098  ;;  %v1406_v43 = vadd.f32 1.0, %v2097_v41 }
 0x9df   : > { %v1405_v44 = vadd.f32 1.0, %v2099_v42 }
 0x9e0   : > { %2100 = vrcp.f32 %v1406_v43 }
 0x9e1   : > { %2102 = vrcp.f32 %v1405_v44 }
 0x9ea   : > { %v2101_v49 = vpop.eup %2100 }
 0x9eb   : > { %v2103_v51 = vpop.eup %2102 }
 0xa13   : > { %v1947_v46 = vpop.f32.mrb[12].mxu1 }
 0xa14   : > { %v1500_v47 = vadd.f32 %v1947_v46, %v1818_v45  ;;  %v1494_v48 = vpop.f32.mrb[13].mxu1 }
 0xa15   : > { %v1495_v50 = vadd.f32 %v1818_v45, %v1494_v48 }
 0xa16   : > { %v1504_v52 = vmul.f32 %v2101_v49, %v1500_v47 }
 0xa17   : > { %v1503_v53 = vmul.f32 %v2103_v51, %v1495_v50 }
 0xa18   : > { %v1506_v7 = vmax.f32 %v1504_v52, 0.0 }
 0xa19   : > { %v1505_v9 = vmax.f32 %v1503_v53, 0.0 }
 0xa1b   : > { %1964 = vmatprep.mubr.msk.f32.mxu0 %vm1519_vm6, %v1505_v9 }
 0xa1c   : > { %1965 = vmatmul.mubr.msk.f32.vlgmr.msra.gmra.mrb[8].mxu0 %vm1519_vm6, %v1506_v7 }
 0xaef   : > { %v1966_v56 = vpop.f32.mrb[8].mxu0 }
 0xaf0   : > { %v1598_v57 = vadd.f32 %v1966_v56, %v1518_v55  ;;  %v1592_v58 = vpop.f32.mrb[9].mxu0 }
 0xaf1   : > { %v1593_v59 = vadd.f32 %v1592_v58, %v1518_v55 }
 0xaf2   : > { %v1602_v60 = vadd.f32 %v1598_v57, %v1386_v20  ;;  %v1637_v20 = vsub.s32 5, %v2550_v35 }
 0xaf3   : > { %v1601_v61 = vadd.f32 %v1593_v59, %v2573_v17 }
 0xaf4   : > { %v1606_v62 = vsel %vm484_vm1, %v1602_v60, 0.0  ;;  %v1638_v24 = vrot.slane %v2554_v37, %v1637_v20 }
 0xaf5   : > { %1607 = vadd.xlane.f32.xlu0 %v1606_v62  ;;  %v1603_v63 = vsel %vm484_vm1, %v1601_v61, 0.0 }
 0xaf6   : > { %1604 = vadd.xlane.f32.xlu1 %v1603_v63 }
 0xb82   : > { %v1608_v0 = vpop.xlane.xlu0 %1607 }
 0xb83   : > { %v1610_v1 = vmul.f32 0.03125, %v1608_v0  ;;  %v1605_v2 = vpop.xlane.xlu1 %1604 }
 0xb84   : > { %v1609_v3 = vmul.f32 0.03125, %v1605_v2 }
 0xb85   : > { %v1612_v4 = vsub.f32 %v1602_v60, %v1610_v1 }
 0xb86   : > { %v1611_v5 = vsub.f32 %v1601_v61, %v1609_v3 }
 0xb87   : > { %v1614_v6 = vmul.f32 %v1612_v4, %v1612_v4 }
 0xb88   : > { %v1613_v8 = vmul.f32 %v1611_v5, %v1611_v5 }
 0xb89   : > { %v1618_v10 = vsel %vm484_vm1, %v1614_v6, 0.0 }
 0xb8a   : > { %1619 = vadd.xlane.f32.xlu0 %v1618_v10  ;;  %v1615_v11 = vsel %vm484_vm1, %v1613_v8, 0.0 }
 0xb8b   : > { %1616 = vadd.xlane.f32.xlu1 %v1615_v11 }
 0xc17   : > { %v1620_v12 = vpop.xlane.xlu0 %1619 }
 0xc18   : > { %v1622_v13 = vmul.f32 0.03125, %v1620_v12  ;;  %v1617_v15 = vpop.xlane.xlu1 %1616 }
 0xc19   : > { %v1621_v16 = vmul.f32 0.03125, %v1617_v15 }
 0xc1a   : > { %v1624_v17 = vadd.f32 1e-05, %v1622_v13 }
 0xc1b   : > { %v1623_v18 = vadd.f32 1e-05, %v1621_v16 }
 0xc1c   : > { %2104 = vrsqrt.f32 %v1624_v17 }
 0xc1d   : > { %2106 = vrsqrt.f32 %v1623_v18 }
 0xc26   : > { %v2105_v22 = vpop.eup %2104 }
 0xc27   : > { %v2107_v23 = vpop.eup %2106  ;;  %v1628_v14 = vmul.f32 %v2105_v22, %v1612_v4 }
 0xc28   : > { %v1627_v25 = vmul.f32 %v2107_v23, %v1611_v5 }
 0xc29   : > { %v1634_v26 = vmul.f32 %v1632_v21, %v1628_v14 }
 0xc2a   : > { %v1633_v27 = vmul.f32 %v1632_v21, %v1627_v25 }
 0xc2b   : > { %v1640_v28 = vadd.f32 %v1638_v24, %v1634_v26 }
 0xc2c   : > { %v1639_v29 = vadd.f32 %v1638_v24, %v1633_v27 }
 0xc2d   : > { %1642 = vst.msk [vmem:[#allocation8 + $0x8] sm:$0xff] %vm484_vm1, %v1640_v28 }
 0xc2e   : > { %1641 = vst.msk [vmem:[#allocation8] sm:$0xff] %vm484_vm1, %v1639_v29 }
 0xc2f   : > { %2179 = shalt.err (!%p2176_p2)
}
 0xc30   : > { %s2671_s15 = sld [smem:[#allocation13_spill]] }
 0xc36   : > { %s2180_s18 = scalar_lea.hbm %s2671_s15, 256 }
 0xc37   : > { %p2181_p13 = scmp.ne.s32.totalorder %s2671_s15, %s2180_s18  ;;  %p2186_p7 = scmp.lt.u32.totalorder %s2180_s18, %s2671_s15 }
 0xc39   : > { %p2182_p11 = pnand %p2181_p13, %p2028_p10 }
 0xc3b   : > { %p2183_p3 = pneg %p2182_p11 }
 0xc3d   : > { %p2188_p6 = pnand %p2186_p7, %p2183_p3 }
 0xc3f   : > { %2191 = shalt.err (!%p2188_p6)
}
 0xc40   : > { %s2249_s22 = smov 128   ;;  %s2250_s23 = smov 8  }
 0xc41   : > { %2014 = dma.vmem_to_hbm [thread:$0]  (%p2028_p10), %s1650_s28, 256, %s2671_s15, [#allocation5], %s2249_s22, %s2249_s22, %s2250_s23  }
 0xc42   : > { %2217 = dma.done.wait (%p2028_p10), [#allocation5], 256  }
 0xc43   : > { %2219 = vsyncadd (%p2028_p10), [#allocation5], 4294967040 }
 0xc44 PF: > { %s2672_s12 = sld [smem:[#allocation12_spill]]  ;;  %s2673_s30 = smov %s2226_s10 }
 0xc45   : > { %s2674_s10 = smov %s2230_s11  ;;  %s2675_s11 = smov %s2372_s24 }
 0xc4a   : > { %p21_p9 = scmp.ge.s32.totalorder %s2672_s12, 4  }
 0xc4c   :  { %23 = sbr.rel (!%p21_p9) target bundleno = 7 (0x7), region = 120 }
 0xc53   :  { %1665 = vsyncpa [#allocation4], 1 }
 0xc54   :  { %1667 = vsyncpa [#allocation4 + $0x1], 1 }
 0xc55   :  { %1668 = vsyncpa [#allocation7], 1 }
 0xc56   :  { %1670 = vsyncpa [#allocation7 + $0x1], 1 }
 0xc57   :  { %1671 = vsyncpa [#allocation5], 1 }
 0xc58   :  { %1673 = vsyncpa [#allocation5 + $0x1], 1 }

</bundles_post_ra>
